<compile_context>
chip_gen: v5e
topology: v5e:2x2
jax: 0.10.0
libtpu: 0.0.40
codegen_flags: <defaults>
</compile_context>

<pallas_src>
import jax
import jax.numpy as jnp
from jax.experimental import pallas as pl
from jax.experimental.pallas import tpu as pltpu

BATCH = 8
IN_DIM = 1
HIDDEN = 128
OUT_DIM = 1


def mlp_kernel(x_ref, w1b1_ref, w2_ref, b2_ref, o_ref):
    x = x_ref[...]                      # (B, 1)
    wb = w1b1_ref[...]                  # (2, 128): row 0 = w1, row 1 = b1
    w1 = wb[0:1, :]                     # (1, 128)
    b1 = wb[1:2, :]                     # (1, 128)

    # layer1: Linear(1, 128) + ReLU — outer product via VPU broadcast, no MXU.
    h = jnp.maximum(x * w1 + b1, 0.0)   # (B, 128)

    # layer2: Linear(128, 1) — elementwise mul + lane reduction (VPU + XLU).
    w2 = w2_ref[...]                    # (1, 128) lane-major
    out = jnp.sum(h * w2, axis=-1, keepdims=True) + b2_ref[0, 0]  # (B, 1)
    o_ref[...] = out.astype(o_ref.dtype)


def mlp_forward(x, w1b1, w2, b2):
    # Tiny shapes: single invocation, whole arrays resident in VMEM/SMEM.
    n = x.shape[0]
    return pl.pallas_call(
        mlp_kernel,
        out_shape=jax.ShapeDtypeStruct((n, OUT_DIM), jnp.float32),
        in_specs=[
            pl.BlockSpec(memory_space=pltpu.MemorySpace.VMEM),   # x       (B, 1)
            pl.BlockSpec(memory_space=pltpu.MemorySpace.VMEM),   # w1|b1   (2, 128)
            pl.BlockSpec(memory_space=pltpu.MemorySpace.VMEM),   # w2      (1, 128)
            pl.BlockSpec(memory_space=pltpu.MemorySpace.SMEM),   # b2      (1, 1)
        ],
        out_specs=pl.BlockSpec(memory_space=pltpu.MemorySpace.VMEM),
    )(x, w1b1, w2, b2)
    # TODO(synk): for large batch, add a batch grid with row tiles of 256-1024,
    # dimension_semantics=("parallel",), and keep weights unblocked.


def init_params(key):
    # Mimics torch.nn.Linear default init: U(-1/sqrt(fan_in), 1/sqrt(fan_in)).
    k1, k2, k3, k4 = jax.random.split(key, 4)
    bound1 = 1.0 / jnp.sqrt(IN_DIM)
    bound2 = 1.0 / jnp.sqrt(HIDDEN)
    w1 = jax.random.uniform(k1, (IN_DIM, HIDDEN), jnp.float32, -bound1, bound1)   # (1, 128)
    b1 = jax.random.uniform(k2, (1, HIDDEN), jnp.float32, -bound1, bound1)        # (1, 128)
    w2 = jax.random.uniform(k3, (OUT_DIM, HIDDEN), jnp.float32, -bound2, bound2)  # (1, 128) lane-major
    b2 = jax.random.uniform(k4, (1, OUT_DIM), jnp.float32, -bound2, bound2)       # (1, 1)
    return w1, b1, w2, b2


if __name__ == "__main__":
    key = jax.random.PRNGKey(0)
    kx, kp = jax.random.split(key)
    x = jax.random.normal(kx, (BATCH, IN_DIM), jnp.float32)
    w1, b1, w2, b2 = init_params(kp)

    # Pack the layer-1 parameters into one dense (2, 128) slab -> single DMA.
    w1b1 = jnp.concatenate([w1, b1], axis=0)

    out = mlp_forward(x, w1b1, w2, b2)
    out = jax.block_until_ready(out)

    # Reference check in plain JAX (w2 stored lane-major, so transpose here).
    ref = jnp.maximum(x @ w1 + b1, 0.0) @ w2.T + b2
    assert out.shape == (BATCH, OUT_DIM)
    assert jnp.allclose(out, ref, atol=1e-5, rtol=1e-5)
    print("KERNEL_OK")
</pallas_src>

<mosaic_0001>
module attributes {stable_mosaic.version = 11 : i64} {
  func.func @mlp_kernel(%arg0: memref<8x1xf32, #tpu.memory_space<vmem>>, %arg1: memref<2x128xf32, #tpu.memory_space<vmem>>, %arg2: memref<1x128xf32, #tpu.memory_space<vmem>>, %arg3: memref<1x1xf32, #tpu.memory_space<smem>>, %arg4: memref<8x1xf32, #tpu.memory_space<vmem>>) attributes {dimension_semantics = [], scalar_prefetch = 0 : i64, scratch_operands = 0 : i64, tpu.core_type = #tpu.core_type<tc>} {
    %c0 = arith.constant 0 : index
    %c0_0 = arith.constant 0 : index
    %0 = vector.load %arg0[%c0, %c0_0] : memref<8x1xf32, #tpu.memory_space<vmem>>, vector<8x1xf32>
    %c0_1 = arith.constant 0 : index
    %c0_2 = arith.constant 0 : index
    %1 = vector.load %arg1[%c0_1, %c0_2] : memref<2x128xf32, #tpu.memory_space<vmem>>, vector<2x128xf32>
    %2 = vector.extract_strided_slice %1 {offsets = [0, 0], sizes = [1, 128], strides = [1, 1]} : vector<2x128xf32> to vector<1x128xf32>
    %3 = vector.extract_strided_slice %1 {offsets = [1, 0], sizes = [1, 128], strides = [1, 1]} : vector<2x128xf32> to vector<1x128xf32>
    %4 = vector.broadcast %0 : vector<8x1xf32> to vector<8x128xf32>
    %5 = vector.broadcast %2 : vector<1x128xf32> to vector<8x128xf32>
    %6 = arith.mulf %4, %5 : vector<8x128xf32>
    %7 = vector.broadcast %3 : vector<1x128xf32> to vector<8x128xf32>
    %8 = arith.addf %6, %7 : vector<8x128xf32>
    %cst = arith.constant 0.000000e+00 : f32
    %9 = vector.broadcast %cst : f32 to vector<8x128xf32>
    %10 = arith.maximumf %8, %9 : vector<8x128xf32>
    %c0_3 = arith.constant 0 : index
    %c0_4 = arith.constant 0 : index
    %11 = vector.load %arg2[%c0_3, %c0_4] : memref<1x128xf32, #tpu.memory_space<vmem>>, vector<1x128xf32>
    %12 = vector.broadcast %11 : vector<1x128xf32> to vector<8x128xf32>
    %13 = arith.mulf %10, %12 : vector<8x128xf32>
    %cst_5 = arith.constant dense<0.000000e+00> : vector<8xf32>
    %14 = vector.multi_reduction <add>, %13, %cst_5 [1] : vector<8x128xf32> to vector<8xf32>
    %15 = vector.shape_cast %14 : vector<8xf32> to vector<8x1xf32>
    %c0_6 = arith.constant 0 : index
    %c0_7 = arith.constant 0 : index
    %16 = memref.load %arg3[%c0_6, %c0_7] : memref<1x1xf32, #tpu.memory_space<smem>>
    %17 = vector.broadcast %16 : f32 to vector<8x1xf32>
    %18 = arith.addf %15, %17 : vector<8x1xf32>
    %c0_8 = arith.constant 0 : index
    %c0_9 = arith.constant 0 : index
    %19 = vector.load %arg4[%c0_8, %c0_9] : memref<8x1xf32, #tpu.memory_space<vmem>>, vector<8x1xf32>
    tpu.vector_store %arg4[%c0_8, %c0_9], %18 {strides = array<i32>} : memref<8x1xf32, #tpu.memory_space<vmem>>, vector<8x1xf32>,
    return
  }
}

</mosaic_0001>

<bundles_post_ra>
// kernel: tpu_custom_call.1
= control target key start
LH: loop header
LB: loop body
LE: loop exit
PB: predicated region body
PF: predicated region fallthrough
CT: control target
= control target key end

     0   :  { %v49_v0 = vmov 0   ;;  %vm40_vm0 = vcmask 7168   ;;  %s90_s0 = inlined_call_operand.vmem [shape: f32[8,1], index: 0, kind: input, shape index: {}]   ;;  %s91_s2 = inlined_call_operand.vmem [shape: f32[1,128], index: 2, kind: input, shape index: {}]   ;;  %s92_s1 = inlined_call_operand.vmem [shape: f32[2,128], index: 1, kind: input, shape index: {}]   ;;  %s93_s3 = inlined_call_operand.<no memory space> [shape: f32[1,1], index: 3, kind: input, shape index: {}]   ;;  %s94_s4 = inlined_call_operand.vmem [shape: f32[8,1], index: 4, kind: output, shape index: {}]  }
   0x1   :  { %47 = vset.pattern.permute.xlu0 %v49_v0  ;;  %v18_v1 = vld [vmem:[%s90_s0] sm:$0xff]  ;;  %v38_v11 = vstv %s93_s3 }
   0x2   :  { %22 = vperm.xlu0 %47, %v18_v1   ;;  %v19_v2 = vld [vmem:[%s92_s1] sm:$0x3] }
   0x3   :  { %v25_v3 = vperm.slane %v19_v2, 0  ;;  %v27_v4 = vperm.slane %v19_v2, 1  ;;  %v48_v8 = vld [vmem:[%s91_s2] ss:$0 sm:$0xff] }
  0x74   :  { %v23_v5 = vpop.permute.xlu0 %22 }
  0x75   :  { %v26_v6 = vmul.f32 %v25_v3, %v23_v5 }
  0x77   :  { %v28_v7 = vadd.f32 %v27_v4, %v26_v6 }
  0x79   :  { %v29_v9 = vmax.f32 %v28_v7, 0.0 }
  0x7b   :  { %v34_v10 = vmul.f32 %v48_v8, %v29_v9 }
  0x7d   :  { %35 = vadd.xlane.f32.xlu0 %v34_v10 }
  0xf0   :  { %v36_v12 = vpop.xlane.xlu0 %35 }
  0xf1   :  { %v39_v13 = vadd.f32 %v38_v11, %v36_v12 }
  0xf3   :  { %41 = vst.msk [vmem:[%s94_s4] sm:$0xff] %vm40_vm0, %v39_v13 }

</bundles_post_ra>
